<compile_context>
chip_gen: v7x
topology: tpu7x:2x2x1
jax: 0.10.0
libtpu: 0.0.40
codegen_flags: <defaults>
</compile_context>

<pallas_src>
import jax
import jax.numpy as jnp
from jax.experimental import pallas as pl
from jax.experimental.pallas import tpu as pltpu

_MIB = 1024 * 1024


# ----------------------------------------------------------------------------
# Fused kernel (one grid step handles one B_TILE-wide column block of batches):
#   adj_ref : [N, E]                 emb_ref : [E, N]
#   x_ref   : [N, BT*C_in]  (bf16)   column b*C_in + i  == x[b, :, i]
#   w_ref   : [K, C_in, C_out] (bf16)
#   b_ref   : [1, C_out]    (f32)
#   out_ref : [N, BT*C_out] (f32)    column b*C_out + o == out[b, :, o]
#   y_ref   : VMEM scratch [K, N, BT*C_in] bf16  (Chebyshev-projected features)
# ----------------------------------------------------------------------------
def _avwgcn_kernel(adj_ref, emb_ref, x_ref, w_ref, b_ref, out_ref, y_ref):
    K, N, _ = y_ref.shape
    C_in = w_ref.shape[1]
    C_out = w_ref.shape[2]
    BT = x_ref.shape[1] // C_in

    # --- supports = softmax(relu(adj @ emb), axis=1) (tiny, recomputed per step) ---
    logits = jnp.dot(adj_ref[...], emb_ref[...], preferred_element_type=jnp.float32)
    logits = jnp.maximum(logits, 0.0)
    m = jnp.max(logits, axis=1, keepdims=True)
    e = jnp.exp(logits - m)
    inv = pl.reciprocal(jnp.sum(e, axis=1, keepdims=True), approx=True)
    s = e * inv
    s_bf = s.astype(jnp.bfloat16)
    s2_bf = (s * 2.0).astype(jnp.bfloat16)          # exact scale, hoisted out of loop

    # --- Chebyshev recurrence applied directly to batch-folded features -----------
    #     Y_0 = X, Y_1 = S @ X, Y_k = 2*S @ Y_{k-1} - Y_{k-2}
    x = x_ref[...]                                   # bf16
    y_ref[0] = x                                     # identity term: no matmul
    y_ref[1] = jnp.dot(s_bf, x, preferred_element_type=jnp.float32).astype(jnp.bfloat16)
    for k in range(2, K):                            # K static -> unrolled
        yk = (jnp.dot(s2_bf, y_ref[k - 1], preferred_element_type=jnp.float32)
              - y_ref[k - 2].astype(jnp.float32))    # subtraction in f32
        y_ref[k] = yk.astype(jnp.bfloat16)

    # --- output contraction: per batch item, acc = bias + sum_k Y_k @ W_k ---------
    #     (no concatenates; direct slice stores into the lane-dense out block)
    w = w_ref[...]                                   # bf16 [K, C_in, C_out]
    bias_full = jnp.broadcast_to(b_ref[...], (N, C_out))   # hoisted, single broadcast
    for b in range(BT):                              # BT static (small) -> unrolled
        cs = b * C_in
        acc = bias_full
        for k in range(K):
            acc = acc + jnp.dot(y_ref[k, :, cs:cs + C_in], w[k],
                                preferred_element_type=jnp.float32)
        out_ref[:, b * C_out:(b + 1) * C_out] = acc


# ----------------------------------------------------------------------------
# Tiling / VMEM planning (static-shape Python, runs at trace time)
# ----------------------------------------------------------------------------
def _vmem_estimate(b_tile, N, E, K, C_in, C_out):
    """Rough per-step VMEM footprint in bytes (incl. Pallas double buffers)."""
    bf, f32 = 2, 4
    x_blk = N * b_tile * C_in * bf
    out_blk = N * b_tile * C_out * f32
    fixed = (2 * N * E) * f32 + K * C_in * C_out * bf + C_out * f32
    scratch = K * N * b_tile * C_in * bf
    temps = N * N * (f32 + 2 * bf) + N * b_tile * (C_in + C_out) * f32
    return 2 * (x_blk + out_blk + fixed) + scratch + temps


def _plan_tiling(B, N, E, K, C_in, C_out):
    try:
        phys_vmem = pltpu.get_tpu_info().vmem_capacity_bytes
    except Exception:
        phys_vmem = 64 * _MIB                        # v7x per-core size: safe floor
    budget = int(phys_vmem * 0.55)

    divisors = [d for d in range(1, B + 1) if B % d == 0]
    # Lane-dense, divisible blocks: both folded lane widths must be 128-multiples.
    aligned = [d for d in divisors
               if (d * C_in) % 128 == 0 and (d * C_out) % 128 == 0]
    # Prefer tiles that fit the budget and leave >= 2 grid steps (pipelining + 2 TCs).
    pipelined = [d for d in aligned
                 if d < B and _vmem_estimate(d, N, E, K, C_in, C_out) <= budget]
    if pipelined:
        b_tile = max(pipelined)
    elif aligned:
        b_tile = min(aligned)
    else:
        b_tile = B                                   # tiny/unaligned: one full block

    est = _vmem_estimate(b_tile, N, E, K, C_in, C_out)
    vmem_limit = min(int(phys_vmem * 0.75), max(32 * _MIB, int(est * 1.5)))
    return b_tile, vmem_limit


# ----------------------------------------------------------------------------
# Wrapper (forward pass of AVWGCN)
# ----------------------------------------------------------------------------
@jax.jit
def avwgcn_forward(x, adj_matrix, adj_embeddings, weights, bias):
    B, N, C_in = x.shape
    K, _, C_out = weights.shape
    E = adj_embeddings.shape[0]
    # The original module is only well-defined for cheb_k >= 2.
    assert K >= 2, "cheb_k must be >= 2"

    b_tile, vmem_limit = _plan_tiling(B, N, E, K, C_in, C_out)
    num_tiles = B // b_tile

    # Layout plumbing (cheap XLA ops outside the kernel):
    #   batch folded into lanes; matmul-only operands cast to bf16 (halves HBM read).
    x_all = jnp.transpose(x, (1, 0, 2)).reshape(N, B * C_in).astype(jnp.bfloat16)
    w_bf = weights.astype(jnp.bfloat16)              # [K, C_in, C_out]
    bias_row = bias.reshape(1, C_out).astype(jnp.float32)

    out_all = pl.pallas_call(
        _avwgcn_kernel,
        out_shape=jax.ShapeDtypeStruct((N, B * C_out), jnp.float32),
        grid_spec=pltpu.PrefetchScalarGridSpec(
            num_scalar_prefetch=0,
            grid=(num_tiles,),
            in_specs=[
                pl.BlockSpec((N, E), lambda i: (0, 0)),                 # adj
                pl.BlockSpec((E, N), lambda i: (0, 0)),                 # emb
                pl.BlockSpec((N, b_tile * C_in), lambda i: (0, i)),     # x column block
                pl.BlockSpec((K, C_in, C_out), lambda i: (0, 0, 0)),    # weights
                pl.BlockSpec((1, C_out), lambda i: (0, 0)),             # bias
            ],
            out_specs=pl.BlockSpec((N, b_tile * C_out), lambda i: (0, i)),
            scratch_shapes=[pltpu.VMEM((K, N, b_tile * C_in), jnp.bfloat16)],
        ),
        compiler_params=pltpu.CompilerParams(
            dimension_semantics=("parallel",),       # batch blocks are independent
            vmem_limit_bytes=vmem_limit),
    )(adj_matrix, adj_embeddings, x_all, w_bf, bias_row)

    # [N, B*C_out] -> [B, N, C_out]
    return jnp.transpose(out_all.reshape(N, B, C_out), (1, 0, 2))


# Pure-JAX (f32) reference mirroring the PyTorch module exactly.
def avwgcn_reference(x, adj_matrix, adj_embeddings, weights, bias, cheb_k):
    supports = jax.nn.softmax(jnp.maximum(adj_matrix @ adj_embeddings, 0.0), axis=1)
    N = adj_matrix.shape[0]
    support_set = [jnp.eye(N, dtype=jnp.float32), supports]
    for _ in range(2, cheb_k):
        support_set.append(2.0 * supports @ support_set[-1] - support_set[-2])
    sup = jnp.stack(support_set, axis=0)                          # [K, N, N]
    x_g = jnp.einsum("knm,bmc->bknc", sup, x)
    x_g = jnp.transpose(x_g, (0, 2, 1, 3))                        # [B, N, K, C_in]
    return jnp.einsum("bnki,kio->bno", x_g, weights) + bias


if __name__ == "__main__":
    # Small shapes consistent with the module's forward.
    B, N, E = 2, 16, 8          # batch, num_nodes, embed_dim
    C_IN, C_OUT, CHEB_K = 4, 8, 3

    key = jax.random.PRNGKey(0)
    k_w, k_b, k_emb, k_adj, k_x = jax.random.split(key, 5)

    # Deterministic parameter init (PyTorch leaves weights/bias uninitialized;
    # normal init is a synthetic stand-in).
    weights = jax.random.normal(k_w, (CHEB_K, C_IN, C_OUT), jnp.float32) * 0.1
    bias = jax.random.normal(k_b, (C_OUT,), jnp.float32) * 0.1
    adj_embeddings = jax.random.normal(k_emb, (E, N), jnp.float32)   # [embed_dim, num_nodes]
    adj_matrix = jax.random.normal(k_adj, (N, E), jnp.float32)       # [num_nodes, embed_dim]
    x = jax.random.normal(k_x, (B, N, C_IN), jnp.float32)            # [B, N, dim_in]

    out = avwgcn_forward(x, adj_matrix, adj_embeddings, weights, bias)
    out = jax.block_until_ready(out)

    ref = avwgcn_reference(x, adj_matrix, adj_embeddings, weights, bias, CHEB_K)
    assert out.shape == (B, N, C_OUT), out.shape
    # bf16 matmul inputs / bf16 x + scratch (f32 accumulation) -> loose tolerance.
    assert jnp.allclose(out, ref, atol=6e-2, rtol=6e-2), "mismatch vs reference"

    print("KERNEL_OK")
</pallas_src>

<mosaic_0001>
module attributes {stable_mosaic.version = 11 : i64} {
  func.func @_avwgcn_kernel(%arg0: i32, %arg1: memref<16x8xf32, #tpu.memory_space<vmem>>, %arg2: memref<8x16xf32, #tpu.memory_space<vmem>>, %arg3: memref<16x8xbf16, #tpu.memory_space<vmem>>, %arg4: memref<3x4x8xbf16, #tpu.memory_space<vmem>>, %arg5: memref<1x8xf32, #tpu.memory_space<vmem>>, %arg6: memref<16x16xf32, #tpu.memory_space<vmem>>, %arg7: memref<3x16x8xbf16, #tpu.memory_space<vmem>>) attributes {dimension_semantics = [#tpu.dimension_semantics<parallel>], iteration_bounds = array<i64: 1>, scalar_prefetch = 0 : i64, scratch_operands = 1 : i64, tpu.core_type = #tpu.core_type<tc>, window_params = [{pipeline_mode = #tpu.pipeline_mode<synchronous>, transform_indices = @transform_0, window_bounds = array<i64: 16, 8>}, {pipeline_mode = #tpu.pipeline_mode<synchronous>, transform_indices = @transform_1, window_bounds = array<i64: 8, 16>}, {transform_indices = @transform_2, window_bounds = array<i64: 16, 8>}, {pipeline_mode = #tpu.pipeline_mode<synchronous>, transform_indices = @transform_3, window_bounds = array<i64: 3, 4, 8>}, {pipeline_mode = #tpu.pipeline_mode<synchronous>, transform_indices = @transform_4, window_bounds = array<i64: 1, 8>}, {transform_indices = @transform_5, window_bounds = array<i64: 16, 16>}]} {
    %c0 = arith.constant 0 : index
    %c0_0 = arith.constant 0 : index
    %0 = vector.load %arg1[%c0, %c0_0] : memref<16x8xf32, #tpu.memory_space<vmem>>, vector<16x8xf32>
    %c0_1 = arith.constant 0 : index
    %c0_2 = arith.constant 0 : index
    %1 = vector.load %arg2[%c0_1, %c0_2] : memref<8x16xf32, #tpu.memory_space<vmem>>, vector<8x16xf32>
    %cst = arith.constant dense<0.000000e+00> : vector<16x16xf32>
    %2 = tpu.matmul %0, %1, %cst {dimension_numbers = #tpu.dot_dimension_numbers<[1], [0], [0], [1], [0, 0, 1, 1], [], []>} : vector<16x8xf32>, vector<8x16xf32>, vector<16x16xf32> -> vector<16x16xf32>
    %cst_3 = arith.constant 0.000000e+00 : f32
    %3 = vector.broadcast %cst_3 : f32 to vector<16x16xf32>
    %4 = arith.maximumf %2, %3 : vector<16x16xf32>
    %cst_4 = arith.constant dense<0xFF800000> : vector<16xf32>
    %5 = vector.multi_reduction <maximumf>, %4, %cst_4 [1] : vector<16x16xf32> to vector<16xf32>
    %6 = vector.shape_cast %5 : vector<16xf32> to vector<16x1xf32>
    %7 = vector.broadcast %6 : vector<16x1xf32> to vector<16x16xf32>
    %8 = arith.subf %4, %7 : vector<16x16xf32>
    %9 = math.exp %8 : vector<16x16xf32>
    %cst_5 = arith.constant dense<0.000000e+00> : vector<16xf32>
    %10 = vector.multi_reduction <add>, %9, %cst_5 [1] : vector<16x16xf32> to vector<16xf32>
    %11 = vector.shape_cast %10 : vector<16xf32> to vector<16x1xf32>
    %12 = tpu.reciprocal %11 {approx = true} : vector<16x1xf32> -> vector<16x1xf32>
    %13 = vector.broadcast %12 : vector<16x1xf32> to vector<16x16xf32>
    %14 = arith.mulf %9, %13 : vector<16x16xf32>
    %15 = arith.truncf %14 : vector<16x16xf32> to vector<16x16xbf16>
    %cst_6 = arith.constant 2.000000e+00 : f32
    %16 = vector.broadcast %cst_6 : f32 to vector<16x16xf32>
    %17 = arith.mulf %14, %16 : vector<16x16xf32>
    %18 = arith.truncf %17 : vector<16x16xf32> to vector<16x16xbf16>
    %c0_7 = arith.constant 0 : index
    %c0_8 = arith.constant 0 : index
    %19 = vector.load %arg3[%c0_7, %c0_8] : memref<16x8xbf16, #tpu.memory_space<vmem>>, vector<16x8xbf16>
    %c0_9 = arith.constant 0 : index
    %c0_10 = arith.constant 0 : index
    %c0_11 = arith.constant 0 : index
    %20 = vector.load %arg7[%c0_9, %c0_10, %c0_11] : memref<3x16x8xbf16, #tpu.memory_space<vmem>>, vector<1x16x8xbf16>
    %21 = vector.shape_cast %20 : vector<1x16x8xbf16> to vector<16x8xbf16>
    %22 = vector.shape_cast %19 : vector<16x8xbf16> to vector<1x16x8xbf16>
    tpu.vector_store %arg7[%c0_9, %c0_10, %c0_11], %22 {strides = array<i32>} : memref<3x16x8xbf16, #tpu.memory_space<vmem>>, vector<1x16x8xbf16>,
    %cst_12 = arith.constant dense<0.000000e+00> : vector<16x8xf32>
    %23 = tpu.matmul %15, %19, %cst_12 {dimension_numbers = #tpu.dot_dimension_numbers<[1], [0], [0], [1], [0, 0, 1, 1], [], []>} : vector<16x16xbf16>, vector<16x8xbf16>, vector<16x8xf32> -> vector<16x8xf32>
    %24 = arith.truncf %23 : vector<16x8xf32> to vector<16x8xbf16>
    %c1 = arith.constant 1 : index
    %c0_13 = arith.constant 0 : index
    %c0_14 = arith.constant 0 : index
    %25 = vector.load %arg7[%c1, %c0_13, %c0_14] : memref<3x16x8xbf16, #tpu.memory_space<vmem>>, vector<1x16x8xbf16>
    %26 = vector.shape_cast %25 : vector<1x16x8xbf16> to vector<16x8xbf16>
    %27 = vector.shape_cast %24 : vector<16x8xbf16> to vector<1x16x8xbf16>
    tpu.vector_store %arg7[%c1, %c0_13, %c0_14], %27 {strides = array<i32>} : memref<3x16x8xbf16, #tpu.memory_space<vmem>>, vector<1x16x8xbf16>,
    %c1_15 = arith.constant 1 : index
    %c0_16 = arith.constant 0 : index
    %c0_17 = arith.constant 0 : index
    %28 = vector.load %arg7[%c1_15, %c0_16, %c0_17] : memref<3x16x8xbf16, #tpu.memory_space<vmem>>, vector<1x16x8xbf16>
    %29 = vector.shape_cast %28 : vector<1x16x8xbf16> to vector<16x8xbf16>
    %cst_18 = arith.constant dense<0.000000e+00> : vector<16x8xf32>
    %30 = tpu.matmul %18, %29, %cst_18 {dimension_numbers = #tpu.dot_dimension_numbers<[1], [0], [0], [1], [0, 0, 1, 1], [], []>} : vector<16x16xbf16>, vector<16x8xbf16>, vector<16x8xf32> -> vector<16x8xf32>
    %c0_19 = arith.constant 0 : index
    %c0_20 = arith.constant 0 : index
    %c0_21 = arith.constant 0 : index
    %31 = vector.load %arg7[%c0_19, %c0_20, %c0_21] : memref<3x16x8xbf16, #tpu.memory_space<vmem>>, vector<1x16x8xbf16>
    %32 = vector.shape_cast %31 : vector<1x16x8xbf16> to vector<16x8xbf16>
    %33 = arith.extf %32 : vector<16x8xbf16> to vector<16x8xf32>
    %34 = arith.subf %30, %33 : vector<16x8xf32>
    %35 = arith.truncf %34 : vector<16x8xf32> to vector<16x8xbf16>
    %c2 = arith.constant 2 : index
    %c0_22 = arith.constant 0 : index
    %c0_23 = arith.constant 0 : index
    %36 = vector.load %arg7[%c2, %c0_22, %c0_23] : memref<3x16x8xbf16, #tpu.memory_space<vmem>>, vector<1x16x8xbf16>
    %37 = vector.shape_cast %36 : vector<1x16x8xbf16> to vector<16x8xbf16>
    %38 = vector.shape_cast %35 : vector<16x8xbf16> to vector<1x16x8xbf16>
    tpu.vector_store %arg7[%c2, %c0_22, %c0_23], %38 {strides = array<i32>} : memref<3x16x8xbf16, #tpu.memory_space<vmem>>, vector<1x16x8xbf16>,
    %c0_24 = arith.constant 0 : index
    %c0_25 = arith.constant 0 : index
    %c0_26 = arith.constant 0 : index
    %39 = vector.load %arg4[%c0_24, %c0_25, %c0_26] : memref<3x4x8xbf16, #tpu.memory_space<vmem>>, vector<3x4x8xbf16>
    %c0_27 = arith.constant 0 : index
    %c0_28 = arith.constant 0 : index
    %40 = vector.load %arg5[%c0_27, %c0_28] : memref<1x8xf32, #tpu.memory_space<vmem>>, vector<1x8xf32>
    %41 = vector.shape_cast %40 : vector<1x8xf32> to vector<1x8xf32>
    %42 = vector.broadcast %41 : vector<1x8xf32> to vector<16x8xf32>
    %c0_29 = arith.constant 0 : index
    %c0_30 = arith.constant 0 : index
    %c0_31 = arith.constant 0 : index
    %43 = vector.load %arg7[%c0_29, %c0_30, %c0_31] : memref<3x16x8xbf16, #tpu.memory_space<vmem>>, vector<1x16x4xbf16>
    %44 = vector.shape_cast %43 : vector<1x16x4xbf16> to vector<16x4xbf16>
    %45 = vector.extract_strided_slice %39 {offsets = [0, 0, 0], sizes = [1, 4, 8], strides = [1, 1, 1]} : vector<3x4x8xbf16> to vector<1x4x8xbf16>
    %46 = vector.shape_cast %45 : vector<1x4x8xbf16> to vector<4x8xbf16>
    %cst_32 = arith.constant dense<0.000000e+00> : vector<16x8xf32>
    %47 = tpu.matmul %44, %46, %cst_32 {dimension_numbers = #tpu.dot_dimension_numbers<[1], [0], [0], [1], [0, 0, 1, 1], [], []>} : vector<16x4xbf16>, vector<4x8xbf16>, vector<16x8xf32> -> vector<16x8xf32>
    %48 = arith.addf %42, %47 : vector<16x8xf32>
    %c1_33 = arith.constant 1 : index
    %c0_34 = arith.constant 0 : index
    %c0_35 = arith.constant 0 : index
    %49 = vector.load %arg7[%c1_33, %c0_34, %c0_35] : memref<3x16x8xbf16, #tpu.memory_space<vmem>>, vector<1x16x4xbf16>
    %50 = vector.shape_cast %49 : vector<1x16x4xbf16> to vector<16x4xbf16>
    %51 = vector.extract_strided_slice %39 {offsets = [1, 0, 0], sizes = [1, 4, 8], strides = [1, 1, 1]} : vector<3x4x8xbf16> to vector<1x4x8xbf16>
    %52 = vector.shape_cast %51 : vector<1x4x8xbf16> to vector<4x8xbf16>
    %cst_36 = arith.constant dense<0.000000e+00> : vector<16x8xf32>
    %53 = tpu.matmul %50, %52, %cst_36 {dimension_numbers = #tpu.dot_dimension_numbers<[1], [0], [0], [1], [0, 0, 1, 1], [], []>} : vector<16x4xbf16>, vector<4x8xbf16>, vector<16x8xf32> -> vector<16x8xf32>
    %54 = arith.addf %48, %53 : vector<16x8xf32>
    %c2_37 = arith.constant 2 : index
    %c0_38 = arith.constant 0 : index
    %c0_39 = arith.constant 0 : index
    %55 = vector.load %arg7[%c2_37, %c0_38, %c0_39] : memref<3x16x8xbf16, #tpu.memory_space<vmem>>, vector<1x16x4xbf16>
    %56 = vector.shape_cast %55 : vector<1x16x4xbf16> to vector<16x4xbf16>
    %57 = vector.extract_strided_slice %39 {offsets = [2, 0, 0], sizes = [1, 4, 8], strides = [1, 1, 1]} : vector<3x4x8xbf16> to vector<1x4x8xbf16>
    %58 = vector.shape_cast %57 : vector<1x4x8xbf16> to vector<4x8xbf16>
    %cst_40 = arith.constant dense<0.000000e+00> : vector<16x8xf32>
    %59 = tpu.matmul %56, %58, %cst_40 {dimension_numbers = #tpu.dot_dimension_numbers<[1], [0], [0], [1], [0, 0, 1, 1], [], []>} : vector<16x4xbf16>, vector<4x8xbf16>, vector<16x8xf32> -> vector<16x8xf32>
    %60 = arith.addf %54, %59 : vector<16x8xf32>
    %c0_41 = arith.constant 0 : index
    %c0_42 = arith.constant 0 : index
    %61 = vector.load %arg6[%c0_41, %c0_42] : memref<16x16xf32, #tpu.memory_space<vmem>>, vector<16x8xf32>
    tpu.vector_store %arg6[%c0_41, %c0_42], %60 {strides = array<i32>} : memref<16x16xf32, #tpu.memory_space<vmem>>, vector<16x8xf32>,
    %c0_43 = arith.constant 0 : index
    %c0_44 = arith.constant 0 : index
    %c4 = arith.constant 4 : index
    %62 = vector.load %arg7[%c0_43, %c0_44, %c4] : memref<3x16x8xbf16, #tpu.memory_space<vmem>>, vector<1x16x4xbf16>
    %63 = vector.shape_cast %62 : vector<1x16x4xbf16> to vector<16x4xbf16>
    %64 = vector.extract_strided_slice %39 {offsets = [0, 0, 0], sizes = [1, 4, 8], strides = [1, 1, 1]} : vector<3x4x8xbf16> to vector<1x4x8xbf16>
    %65 = vector.shape_cast %64 : vector<1x4x8xbf16> to vector<4x8xbf16>
    %cst_45 = arith.constant dense<0.000000e+00> : vector<16x8xf32>
    %66 = tpu.matmul %63, %65, %cst_45 {dimension_numbers = #tpu.dot_dimension_numbers<[1], [0], [0], [1], [0, 0, 1, 1], [], []>} : vector<16x4xbf16>, vector<4x8xbf16>, vector<16x8xf32> -> vector<16x8xf32>
    %67 = arith.addf %42, %66 : vector<16x8xf32>
    %c1_46 = arith.constant 1 : index
    %c0_47 = arith.constant 0 : index
    %c4_48 = arith.constant 4 : index
    %68 = vector.load %arg7[%c1_46, %c0_47, %c4_48] : memref<3x16x8xbf16, #tpu.memory_space<vmem>>, vector<1x16x4xbf16>
    %69 = vector.shape_cast %68 : vector<1x16x4xbf16> to vector<16x4xbf16>
    %70 = vector.extract_strided_slice %39 {offsets = [1, 0, 0], sizes = [1, 4, 8], strides = [1, 1, 1]} : vector<3x4x8xbf16> to vector<1x4x8xbf16>
    %71 = vector.shape_cast %70 : vector<1x4x8xbf16> to vector<4x8xbf16>
    %cst_49 = arith.constant dense<0.000000e+00> : vector<16x8xf32>
    %72 = tpu.matmul %69, %71, %cst_49 {dimension_numbers = #tpu.dot_dimension_numbers<[1], [0], [0], [1], [0, 0, 1, 1], [], []>} : vector<16x4xbf16>, vector<4x8xbf16>, vector<16x8xf32> -> vector<16x8xf32>
    %73 = arith.addf %67, %72 : vector<16x8xf32>
    %c2_50 = arith.constant 2 : index
    %c0_51 = arith.constant 0 : index
    %c4_52 = arith.constant 4 : index
    %74 = vector.load %arg7[%c2_50, %c0_51, %c4_52] : memref<3x16x8xbf16, #tpu.memory_space<vmem>>, vector<1x16x4xbf16>
    %75 = vector.shape_cast %74 : vector<1x16x4xbf16> to vector<16x4xbf16>
    %76 = vector.extract_strided_slice %39 {offsets = [2, 0, 0], sizes = [1, 4, 8], strides = [1, 1, 1]} : vector<3x4x8xbf16> to vector<1x4x8xbf16>
    %77 = vector.shape_cast %76 : vector<1x4x8xbf16> to vector<4x8xbf16>
    %cst_53 = arith.constant dense<0.000000e+00> : vector<16x8xf32>
    %78 = tpu.matmul %75, %77, %cst_53 {dimension_numbers = #tpu.dot_dimension_numbers<[1], [0], [0], [1], [0, 0, 1, 1], [], []>} : vector<16x4xbf16>, vector<4x8xbf16>, vector<16x8xf32> -> vector<16x8xf32>
    %79 = arith.addf %73, %78 : vector<16x8xf32>
    %c0_54 = arith.constant 0 : index
    %c8 = arith.constant 8 : index
    %80 = vector.load %arg6[%c0_54, %c8] : memref<16x16xf32, #tpu.memory_space<vmem>>, vector<16x8xf32>
    tpu.vector_store %arg6[%c0_54, %c8], %79 {strides = array<i32>} : memref<16x16xf32, #tpu.memory_space<vmem>>, vector<16x8xf32>,
    return
  }
  func.func @transform_0(%arg0: i32) -> (i32, i32) {
    %c0_i32 = arith.constant 0 : i32
    %c0_i32_0 = arith.constant 0 : i32
    %c0_i32_1 = arith.constant 0 : i32
    return %c0_i32, %c0_i32_0 : i32, i32
  }
  func.func @transform_1(%arg0: i32) -> (i32, i32) {
    %c0_i32 = arith.constant 0 : i32
    %c0_i32_0 = arith.constant 0 : i32
    %c0_i32_1 = arith.constant 0 : i32
    return %c0_i32, %c0_i32_0 : i32, i32
  }
  func.func @transform_2(%arg0: i32) -> (i32, i32) {
    %c0_i32 = arith.constant 0 : i32
    %c0_i32_0 = arith.constant 0 : i32
    return %c0_i32, %arg0 : i32, i32
  }
  func.func @transform_3(%arg0: i32) -> (i32, i32, i32) {
    %c0_i32 = arith.constant 0 : i32
    %c0_i32_0 = arith.constant 0 : i32
    %c0_i32_1 = arith.constant 0 : i32
    %c0_i32_2 = arith.constant 0 : i32
    return %c0_i32, %c0_i32_0, %c0_i32_1 : i32, i32, i32
  }
  func.func @transform_4(%arg0: i32) -> (i32, i32) {
    %c0_i32 = arith.constant 0 : i32
    %c0_i32_0 = arith.constant 0 : i32
    %c0_i32_1 = arith.constant 0 : i32
    return %c0_i32, %c0_i32_0 : i32, i32
  }
  func.func @transform_5(%arg0: i32) -> (i32, i32) {
    %c0_i32 = arith.constant 0 : i32
    %c0_i32_0 = arith.constant 0 : i32
    return %c0_i32, %arg0 : i32, i32
  }
}

</mosaic_0001>

<bundles_post_ra>
// kernel: avwgcn_forward.1
= control target key start
LH: loop header
LB: loop body
LE: loop exit
PB: predicated region body
PF: predicated region fallthrough
CT: control target
= control target key end

     0   :  { %vm24_vm0 = vcmask 64512   ;;  %vm108_vm1 = vcmask 130048   ;;  %v690_v19 = vmov 0.0   ;;  %vm691_vm2 = vmmov 0   ;;  %s692_s25 = smov 124   ;;  %s809_s1 = inlined_call_operand.vmem [shape: f32[8,16], index: 1, kind: input, shape index: {}]   ;;  %s810_s0 = inlined_call_operand.vmem [shape: f32[16,8], index: 0, kind: input, shape index: {}]   ;;  %s811_s2 = inlined_call_operand.vmem [shape: bf16[16,8], index: 2, kind: input, shape index: {}]   ;;  %s812_s3 = inlined_call_operand.vmem [shape: bf16[3,4,8], index: 3, kind: input, shape index: {}]   ;;  %s813_s4 = inlined_call_operand.vmem [shape: f32[1,8], index: 4, kind: input, shape index: {}]   ;;  %s814_s5 = inlined_call_operand.vmem [shape: f32[16,16], index: 5, kind: output, shape index: {}]  }
   0x1   :  { %v23_v0 = vld [vmem:[%s809_s1] sm:$0xff]  ;;  %v22_v2 = vld [vmem:[%s810_s0 + $0x8] sm:$0xff]  ;;  %609 = vmatprep.subr.bf16.mxu1 %v690_v19  ;;  %611 = vmatprep.mubr.msk.bf16.mxu1 %vm691_vm2, %v690_v19  ;;  %vm259_vm3 = vcmask 1041408   ;;  %vm255_vm4 = vcmask 31744   ;;  %vm566_vm5 = vcmask 130112  }
   0x2   :  { %v21_v1 = vld [vmem:[%s810_s0] sm:$0xff]  ;;  %604 = vmatprep.subr.mxu0 %v23_v0 }
   0x3   :  { %606 = vmatprep.mubr.msk.f32.mxu0 %vm24_vm0, %v21_v1  ;;  %605 = vmatpush3.msra.mxu0 %v23_v0  ;;  %v681_v20 = vld [vmem:[%s811_s2] sm:$0xff]  }
   0x4   :  { %607 = vmatmul.mubr.msk.f32.vlgmr.msra.gmra.mrb[0].mxu0 %vm24_vm0, %v22_v2  ;;  %615 = vmatprep.subr.bf16.mxu0 %v690_v19  ;;  %143 = vst.msk [vmem:[#allocation2] sm:$0xff] %vm24_vm0, %v681_v20  ;;  %v244_v26 = vld [vmem:[%s812_s3] sm:$0x3]  ;;  %v245_v34 = vld [vmem:[%s812_s3 + $0x2] sm:$0x3] }
   0x5   :  { %617 = vmatprep.mubr.msk.bf16.mxu0 %vm691_vm2, %v690_v19  ;;  %610 = vmatpush3.bf16.msra.mxu1 %v681_v20  ;;  %v261_v31 = vsel %vm259_vm3, %v244_v26, 0  ;;  %v311_v35 = vsel %vm259_vm3, %v245_v34, 0  ;;  %v246_v43 = vld [vmem:[%s812_s3 + $0x4] sm:$0x3]  ;;  %v578_v57 = vld [vmem:[%s813_s4] ss:$0 sm:$0xff] }
   0x6   :  { %621 = vmatprep.subr.bf16.mxu1 %v690_v19  ;;  %v361_v44 = vsel %vm259_vm3, %v246_v43, 0  ;;  %s693_s4 = smov 8  }
   0xb   :  { %v408_v33 = vld [vmem:[#allocation2] sm:$0xff] }
   0xc   :  { %v237_v46 = vunpack.c.l.bf16 %v408_v33  ;;  %v238_v47 = vunpack.c.h.bf16 %v408_v33 }
  0xd7   :  { %v608_v3 = vpop.f32.mrb[0].mxu0 }
  0xd8   :  { %v97_v4 = vpop.f32.mrb[1].mxu0  ;;  %v107_v6 = vmax.f32 %v608_v3, 0.0 }
  0xd9   :  { %v106_v5 = vmax.f32 %v97_v4, 0.0 }
  0xda   :  { %v112_v8 = vsel %vm108_vm1, %v107_v6, -inf }
  0xdb   :  { %v109_v7 = vsel %vm108_vm1, %v106_v5, -inf }
  0xdc   :  { %110 = vmax.xlane.f32.xlu0 %v109_v7 }
  0xe0   :  { %113 = vmax.xlane.f32.xlu0 %v112_v8 }
  0xf6   :  { %410 = vrot.lane.b32.xlu0 %v408_v33, %s692_s25 }
 0x169   :  { %v111_v9 = vpop.xlane.xlu0 %110 }
 0x16a   :  { %v115_v10 = vsub.f32 %v106_v5, %v111_v9 }
 0x16c   :  { %v117_v11 = vmul.f32 1.442695, %v115_v10 }
 0x16d   :  { %v114_v12 = vpop.xlane.xlu0 %113 }
 0x16e   :  { %682 = vpow2.f32 %v117_v11  ;;  %v116_v13 = vsub.f32 %v107_v6, %v114_v12 }
 0x170   :  { %v119_v14 = vmul.f32 1.442695, %v116_v13 }
 0x171   :  { %v411_v42 = vpop.permute.xlu0 %410 }
 0x172   :  { %684 = vpow2.f32 %v119_v14 }
 0x178   :  { %v683_v15 = vpop.eup %682 }
 0x179   :  { %v121_v16 = vsel %vm108_vm1, %v683_v15, 0.0 }
 0x17a   :  { %122 = vadd.xlane.f32.xlu1 %v121_v16 }
 0x17c   :  { %v685_v17 = vpop.eup %684 }
 0x17d   :  { %v124_v18 = vsel %vm108_vm1, %v685_v17, 0.0 }
 0x17e   :  { %125 = vadd.xlane.f32.xlu1 %v124_v18 }
 0x207   :  { %v123_v21 = vpop.xlane.xlu1 %122 }
 0x208   :  { %686 = vrcp.f32 %v123_v21 }
 0x20b   :  { %v126_v22 = vpop.xlane.xlu1 %125 }
 0x20c   :  { %688 = vrcp.f32 %v126_v22 }
 0x212   :  { %v687_v23 = vpop.eup %686 }
 0x213   :  { %v129_v24 = vmul.f32 %v687_v23, %v683_v15 }
 0x215   :  { %v132_v29 = vmul.f32 2.0, %v129_v24 }
 0x216   :  { %v689_v25 = vpop.eup %688 }
 0x217   :  { %v130_v27 = vmul.f32 %v689_v25, %v685_v17 }
 0x219   :  { %v131_v28 = vpack.c.bf16 %v130_v27, %v129_v24  ;;  %v133_v30 = vmul.f32 2.0, %v130_v27 }
 0x21b   :  { %612 = vmatmul.mubr.msk.bf16.vlgmr.msra.gmra.mrb[0].mxu1 %vm108_vm1, %v131_v28  ;;  %v134_v32 = vpack.c.bf16 %v133_v30, %v132_v29 }
 0x21c   :  { %622 = vmatpush3.bf16.msra.mxu1 %v261_v31  ;;  %623 = vmatprep.mubr.msk.bf16.mxu1 %vm691_vm2, %v690_v19 }
 0x21d   :  { %627 = vmatprep.subr.bf16.mxu1 %v690_v19 }
 0x223   :  { %624 = vmatmul.mubr.msk.bf16.vlgmr.msra.gmra.mrb[4].mxu1 %vm255_vm4, %v408_v33 }
 0x224   :  { %629 = vmatprep.mubr.msk.bf16.mxu1 %vm691_vm2, %v690_v19  ;;  %628 = vmatpush3.bf16.msra.mxu1 %v311_v35 }
 0x225   :  { %633 = vmatprep.subr.bf16.mxu1 %v690_v19 }
 0x2ee   :  { %v181_v36 = vpop.f32.mrb[0].mxu1 }
 0x2ef   :  { %v613_v37 = vpop.f32.mrb[1].mxu1 }
 0x2f0   :  { %v184_v38 = vpop.f32.mrb[2].mxu1 }
 0x2f1   :  { %v188_v39 = vpack.c.bf16 %v184_v38, %v181_v36  ;;  %v614_v40 = vpop.f32.mrb[3].mxu1 }
 0x2f3   :  { %190 = vst.msk [vmem:[#allocation2 + $0x8] sm:$0xff] %vm24_vm0, %v188_v39 }
 0x2fa   :  { %v458_v41 = vld [vmem:[#allocation2 + $0x8] sm:$0xff] }
 0x2fb   :  { %460 = vrot.lane.b32.xlu1 %v458_v41, %s692_s25  ;;  %616 = vmatpush3.bf16.msra.mxu0 %v458_v41 }
 0x2fc   :  { %630 = vmatmul.mubr.msk.bf16.vlgmr.msra.gmra.mrb[4].mxu1 %vm255_vm4, %v458_v41  ;;  %639 = vmatprep.subr.bf16.mxu0 %v690_v19 }
 0x2fd   :  { %635 = vmatprep.mubr.msk.bf16.mxu1 %vm691_vm2, %v690_v19  ;;  %634 = vmatpush3.bf16.msra.mxu1 %v361_v44 }
 0x2fe   :  { %618 = vmatmul.mubr.msk.bf16.vlgmr.msra.gmra.mrb[4].mxu0 %vm108_vm1, %v134_v32 }
 0x2ff   :  { %640 = vmatpush3.bf16.msra.mxu0 %v261_v31  ;;  %641 = vmatprep.mubr.msk.bf16.mxu0 %vm691_vm2, %v690_v19 }
 0x300   :  { %645 = vmatprep.subr.bf16.mxu0 %v690_v19 }
 0x306   :  { %642 = vmatmul.mubr.msk.bf16.vlgmr.msra.gmra.mrb[8].mxu0 %vm255_vm4, %v411_v42 }
 0x307   :  { %646 = vmatpush3.bf16.msra.mxu0 %v311_v35  ;;  %647 = vmatprep.mubr.msk.bf16.mxu0 %vm691_vm2, %v690_v19 }
 0x308   :  { %651 = vmatprep.subr.bf16.mxu0 %v690_v19 }
 0x36d   :  { %v461_v45 = vpop.permute.xlu1 %460 }
 0x36e   :  { %648 = vmatmul.mubr.msk.bf16.vlgmr.msra.gmra.mrb[8].mxu0 %vm255_vm4, %v461_v45 }
 0x36f   :  { %652 = vmatpush3.bf16.msra.mxu0 %v361_v44  ;;  %653 = vmatprep.mubr.msk.bf16.mxu0 %vm691_vm2, %v690_v19 }
 0x3d1   :  { %v229_v48 = vpop.f32.mrb[4].mxu0 }
 0x3d2   :  { %v619_v49 = vpop.f32.mrb[5].mxu0  ;;  %v239_v51 = vsub.f32 %v229_v48, %v237_v46 }
 0x3d3   :  { %v232_v50 = vpop.f32.mrb[6].mxu0 }
 0x3d4   :  { %v240_v52 = vsub.f32 %v232_v50, %v238_v47  ;;  %v620_v53 = vpop.f32.mrb[7].mxu0 }
 0x3d6   :  { %v241_v54 = vpack.c.bf16 %v240_v52, %v239_v51 }
 0x3d8   :  { %243 = vst.msk [vmem:[#allocation2 + $0x10] sm:$0xff] %vm24_vm0, %v241_v54 }
 0x3df   :  { %v508_v55 = vld [vmem:[#allocation2 + $0x10] sm:$0xff] }
 0x3e0   :  { %510 = vrot.lane.b32.xlu1 %v508_v55, %s692_s25  ;;  %636 = vmatmul.mubr.msk.bf16.vlgmr.msra.gmra.mrb[4].mxu1 %vm255_vm4, %v508_v55 }
 0x452   :  { %v511_v56 = vpop.permute.xlu1 %510 }
 0x453   :  { %654 = vmatmul.mubr.msk.bf16.vlgmr.msra.gmra.mrb[8].mxu0 %vm255_vm4, %v511_v56 }
 0x4b3   :  { %v397_v58 = vpop.f32.mrb[4].mxu1 }
 0x4b4   :  { %v657_v59 = vadd.f32 %v578_v57, %v397_v58  ;;  %v637_v60 = vpop.f32.mrb[5].mxu1 }
 0x4b5   :  { %v400_v61 = vpop.f32.mrb[6].mxu1 }
 0x4b6   :  { %406 = vst.msk [vmem:[%s814_s5] sm:$0xff] %vm24_vm0, %v657_v59  ;;  %v658_v62 = vadd.f32 %v578_v57, %v400_v61  ;;  %v638_v63 = vpop.f32.mrb[7].mxu1 }
 0x4b8   :  { %407 = vst.msk [vmem:[%s814_s5 + $0x8] sm:$0xff] %vm24_vm0, %v658_v62 }
 0x526   :  { %v549_v0 = vpop.f32.mrb[8].mxu0 }
 0x527   :  { %v659_v1 = vadd.f32 %v578_v57, %v549_v0  ;;  %v655_v2 = vpop.f32.mrb[9].mxu0 }
 0x528   :  { %v552_v3 = vpop.f32.mrb[10].mxu0 }
 0x529   :  { %v660_v4 = vadd.f32 %v578_v57, %v552_v3  ;;  %560 = vrot.lane.b32.xlu1 %v659_v1, %s693_s4  ;;  %v656_v5 = vpop.f32.mrb[11].mxu0 }
 0x52b   :  { %562 = vrot.lane.b32.xlu0 %v660_v4, %s693_s4 }
 0x59b   :  { %v561_v6 = vpop.permute.xlu1 %560 }
 0x59c   :  { %567 = vst.msk [vmem:[%s814_s5] sm:$0xff] %vm566_vm5, %v561_v6 }
 0x59d   :  { %v563_v7 = vpop.permute.xlu0 %562 }
 0x59e   :  { %568 = vst.msk [vmem:[%s814_s5 + $0x8] sm:$0xff] %vm566_vm5, %v563_v7 }

</bundles_post_ra>
